<compile_context>
chip_gen: v5e
topology: v5e:2x2
jax: 0.10.0
libtpu: 0.0.40
codegen_flags: <defaults>
</compile_context>

<pallas_src>
import math

import jax
import jax.numpy as jnp
from jax import lax
from jax.experimental import pallas as pl
from jax.experimental.pallas import tpu as pltpu


def _vmem_budget_bytes():
    """~75% of physical per-core VMEM (v5e/v6e: ~96 MiB, v7x: ~48 MiB)."""
    cap = 64 << 20  # conservative default (v7x per-TC physical VMEM)
    try:
        info = pltpu.get_tpu_info()
        c = getattr(info, "vmem_capacity_bytes", None)
        if c:
            cap = int(c)
    except Exception:
        pass
    return max(32 << 20, min((cap * 3) // 4, 100 << 20))


def _conv1d_sigmoid(y, w_ref, b_ref, k, pad):
    """Zero-padded 1-D conv (k taps) along the channel axis + bias + sigmoid.

    y: (rows, C) pooled means (f32), C on lanes.  w_ref: (k,) SMEM, b_ref: (1,).
    out[r, c] = sigmoid(bias + sum_j w[j] * y[r, c + j - pad])   (zero padded)
    """
    rows, C = y.shape
    idx = lax.broadcasted_iota(jnp.int32, (rows, C), 1)
    out = jnp.full((rows, C), b_ref[0], dtype=jnp.float32)
    for j in range(k):                                   # k is tiny & static
        d = j - pad
        shifted = y if d == 0 else pltpu.roll(y, shift=(-d) % C, axis=1)
        valid = (idx + d >= 0) & (idx + d < C)
        out = out + w_ref[j] * jnp.where(valid, shifted, 0.0)
    return jax.nn.sigmoid(out)


# ------------------------- single-pass (fused) path -------------------------

def _eca_single_pass(x2, w, bias, k, pad, donate, vmem_budget):
    B, C, HW = x2.shape
    nbytes = x2.dtype.itemsize
    per_image = C * HW * nbytes
    inv_hw = 1.0 / float(HW)

    # Batch-fuse images per grid step toward a ~4 MiB lane-dense block,
    # bounded by the VMEM budget (double-buffered in + out ~= 4x block).
    max_bb_vmem = max(1, (vmem_budget - (4 << 20)) // (4 * per_image))
    bb = min(B, max(1, (4 << 20) // per_image), max_bb_vmem)
    # Keep >= 2 grid steps when the batch allows and blocks stay >= 1 MiB
    # (feeds both v7x TensorCores without dropping below the DMA sweet spot).
    if bb >= B and B >= 2 and ((B + 1) // 2) * per_image >= (1 << 20):
        bb = (B + 1) // 2
    grid_b = pl.cdiv(B, bb)                      # ragged tail -> masked writeback

    block_bytes = bb * per_image
    vmem_limit = min(max(4 * block_bytes + (4 << 20), 32 << 20), vmem_budget)

    def kernel(w_ref, b_ref, x_ref, o_ref):
        x = x_ref[...]                                        # (bb, C, HW)
        # Global average pool with f32 accumulation (no full-block f32 copy).
        y = jnp.sum(x, axis=-1, dtype=jnp.float32) * inv_hw   # (bb, C)
        attn = _conv1d_sigmoid(y, w_ref, b_ref, k, pad)       # (bb, C) f32
        o_ref[...] = x * attn.astype(x.dtype)[:, :, None]

    cost = pl.CostEstimate(
        flops=2 * B * C * HW + 4 * B * C * k,
        transcendentals=B * C,
        bytes_accessed=2 * B * C * HW * nbytes,
    )
    return pl.pallas_call(
        kernel,
        out_shape=jax.ShapeDtypeStruct((B, C, HW), x2.dtype),
        grid_spec=pltpu.PrefetchScalarGridSpec(
            num_scalar_prefetch=0,
            grid=(grid_b,),
            in_specs=[
                pl.BlockSpec(memory_space=pltpu.MemorySpace.SMEM),   # (k,) taps
                pl.BlockSpec(memory_space=pltpu.MemorySpace.SMEM),   # (1,) bias
                pl.BlockSpec((bb, C, HW), lambda b: (b, 0, 0)),      # x block
            ],
            out_specs=pl.BlockSpec((bb, C, HW), lambda b: (b, 0, 0)),
        ),
        compiler_params=pltpu.CompilerParams(
            dimension_semantics=("parallel",),
            vmem_limit_bytes=vmem_limit,
        ),
        input_output_aliases={2: 0} if donate else {},
        cost_estimate=cost,
    )(w, bias, x2)


# ---------------------- two-pass (VMEM-bounded) fallback ---------------------

def _eca_two_pass(x2, w, bias, k, pad, donate, vmem_budget):
    B, C, HW = x2.shape
    nbytes = x2.dtype.itemsize
    inv_hw = 1.0 / float(HW)

    # Lane-dense spatial tiles toward the DMA sweet spot (bigger on big-VMEM
    # chips), multiples of 128 lanes.  Ragged tails are masked in-kernel /
    # dropped by masked writeback — no jnp.pad or trailing slice (no extra
    # HBM sweeps).
    tile_target = (6 << 20) if vmem_budget >= (64 << 20) else (4 << 20)
    target_elems = max(128, tile_target // max(1, C * nbytes))
    tile = max(128, (target_elems // 128) * 128)
    tile = min(tile, pl.cdiv(HW, 128) * 128)
    nt = pl.cdiv(HW, tile)
    tile_bytes = C * tile * nbytes
    vmem_limit = min(max(4 * tile_bytes + (4 << 20), 32 << 20), vmem_budget)

    # ---- pass 1: tiled global average pool + conv1d + sigmoid -> (B, C, 1) --
    def attn_kernel(w_ref, b_ref, x_ref, a_ref, acc_ref):
        t = pl.program_id(1)

        @pl.when(t == 0)
        def _():
            acc_ref[...] = jnp.zeros_like(acc_ref)

        # Mask the ragged tail tile instead of padding x in HBM.
        lane = lax.broadcasted_iota(jnp.int32, (1, C, tile), 2) + t * tile
        xm = jnp.where(lane < HW, x_ref[...].astype(jnp.float32), 0.0)
        acc_ref[...] += jnp.sum(xm, axis=-1)                  # (1, C)

        @pl.when(t == pl.num_programs(1) - 1)
        def _():
            y = acc_ref[...] * inv_hw                         # true mean: /HW
            attn = _conv1d_sigmoid(y, w_ref, b_ref, k, pad)   # (1, C) f32
            # Store with C on sublanes so pass 2 broadcasts along lanes freely.
            a_ref[...] = attn[:, :, None]

    attn = pl.pallas_call(
        attn_kernel,
        out_shape=jax.ShapeDtypeStruct((B, C, 1), jnp.float32),
        grid_spec=pltpu.PrefetchScalarGridSpec(
            num_scalar_prefetch=0,
            grid=(B, nt),
            in_specs=[
                pl.BlockSpec(memory_space=pltpu.MemorySpace.SMEM),
                pl.BlockSpec(memory_space=pltpu.MemorySpace.SMEM),
                pl.BlockSpec((1, C, tile), lambda b, t: (b, 0, t)),
            ],
            out_specs=pl.BlockSpec((1, C, 1), lambda b, t: (b, 0, 0)),
            scratch_shapes=[pltpu.VMEM((1, C), jnp.float32)],
        ),
        compiler_params=pltpu.CompilerParams(
            dimension_semantics=("parallel", "arbitrary"),
            vmem_limit_bytes=vmem_limit,
        ),
        cost_estimate=pl.CostEstimate(
            flops=B * C * HW + 4 * B * C * k,
            transcendentals=B * C,
            bytes_accessed=B * C * HW * nbytes + B * C * 4,
        ),
    )(w, bias, x2)

    # ---------------- pass 2: spatially tiled channel rescale ----------------
    def scale_kernel(a_ref, x_ref, o_ref):
        a = a_ref[...]                                        # (1, C, 1) f32
        o_ref[...] = x_ref[...] * a.astype(o_ref.dtype)

    return pl.pallas_call(
        scale_kernel,
        out_shape=jax.ShapeDtypeStruct((B, C, HW), x2.dtype),
        grid_spec=pltpu.PrefetchScalarGridSpec(
            num_scalar_prefetch=0,
            grid=(B, nt),
            in_specs=[
                pl.BlockSpec((1, C, 1), lambda b, t: (b, 0, 0)),
                pl.BlockSpec((1, C, tile), lambda b, t: (b, 0, t)),
            ],
            out_specs=pl.BlockSpec((1, C, tile), lambda b, t: (b, 0, t)),
        ),
        compiler_params=pltpu.CompilerParams(
            dimension_semantics=("parallel", "parallel"),
            vmem_limit_bytes=vmem_limit,
        ),
        input_output_aliases={1: 0} if donate else {},
        cost_estimate=pl.CostEstimate(
            flops=B * C * HW,
            transcendentals=0,
            bytes_accessed=2 * B * C * HW * nbytes,
        ),
    )(attn, x2)


# --------------------------------- wrapper -----------------------------------

def eca_forward(x, w, bias, k, pad, donate=False):
    """ECA forward. Set donate=True only if the caller actually donates x."""
    B, C, H, W = x.shape
    HW = H * W
    x2 = x.reshape(B, C, HW)                 # free: collapses trailing dims
    per_image = C * HW * x.dtype.itemsize
    vmem_budget = _vmem_budget_bytes()
    # Fused single pass whenever one image's block (double-buffered in + out)
    # fits the per-generation VMEM budget; otherwise the two-pass fallback.
    if 4 * per_image + (4 << 20) <= vmem_budget:
        out2 = _eca_single_pass(x2, w, bias, k, pad, donate, vmem_budget)
    else:
        out2 = _eca_two_pass(x2, w, bias, k, pad, donate, vmem_budget)
    return out2.reshape(B, C, H, W)


def eca_reference(x, w, bias, k, pad):
    """Pure-JAX reference mirroring the PyTorch forward."""
    y = jnp.mean(x, axis=(2, 3))                         # (B, C)
    yp = jnp.pad(y, ((0, 0), (pad, pad)))
    out = jnp.zeros_like(y) + bias[0]
    for j in range(k):
        out = out + w[j] * yp[:, j:j + y.shape[1]]
    attn = jax.nn.sigmoid(out)
    return x * attn[:, :, None, None]


if __name__ == "__main__":
    # Module hyper-params (ECANET(channel=16, b=1, gamma=2))
    B, C, H, W = 2, 16, 16, 16
    b_hp, gamma = 1, 2
    kernel_size = int(abs((math.log(C, 2) + b_hp) / gamma))
    kernel_size = kernel_size if kernel_size % 2 else kernel_size + 1
    padding = (kernel_size - 1) // 2

    key = jax.random.PRNGKey(0)
    kx, kw, kb = jax.random.split(key, 3)
    x = jax.random.normal(kx, (B, C, H, W), dtype=jnp.float32)
    # Conv1d(1, 1, kernel_size) parameters, flat 1-D (SMEM-friendly).
    bound = 1.0 / math.sqrt(kernel_size)
    w = jax.random.uniform(kw, (kernel_size,), jnp.float32, -bound, bound)
    bias = jax.random.uniform(kb, (1,), jnp.float32, -bound, bound)

    fwd = jax.jit(lambda x, w, b: eca_forward(x, w, b, kernel_size, padding))
    out = jax.block_until_ready(fwd(x, w, bias))

    ref = eca_reference(x, w, bias, kernel_size, padding)
    assert out.shape == (B, C, H, W)
    assert jnp.allclose(out, ref, rtol=1e-5, atol=1e-5), "mismatch vs reference"

    print("KERNEL_OK")
</pallas_src>

<mosaic_0001>
module attributes {stable_mosaic.version = 11 : i64} {
  func.func @kernel(%arg0: i32, %arg1: memref<3xf32, #tpu.memory_space<smem>>, %arg2: memref<1xf32, #tpu.memory_space<smem>>, %arg3: memref<2x16x256xf32, #tpu.memory_space<vmem>>, %arg4: memref<2x16x256xf32, #tpu.memory_space<vmem>>) attributes {dimension_semantics = [#tpu.dimension_semantics<parallel>], iteration_bounds = array<i64: 1>, scalar_prefetch = 0 : i64, scratch_operands = 0 : i64, tpu.core_type = #tpu.core_type<tc>, window_params = [{transform_indices = @transform_0, window_bounds = array<i64: 3>}, {transform_indices = @transform_1, window_bounds = array<i64: 1>}, {transform_indices = @transform_2, window_bounds = array<i64: 2, 16, 256>}, {transform_indices = @transform_3, window_bounds = array<i64: 2, 16, 256>}]} {
    %c0 = arith.constant 0 : index
    %c0_0 = arith.constant 0 : index
    %c0_1 = arith.constant 0 : index
    %0 = vector.load %arg3[%c0, %c0_0, %c0_1] : memref<2x16x256xf32, #tpu.memory_space<vmem>>, vector<2x16x256xf32>
    %cst = arith.constant dense<0.000000e+00> : vector<2x16xf32>
    %1 = vector.multi_reduction <add>, %0, %cst [2] : vector<2x16x256xf32> to vector<2x16xf32>
    %cst_2 = arith.constant 3.906250e-03 : f32
    %2 = vector.broadcast %cst_2 : f32 to vector<2x16xf32>
    %3 = arith.mulf %1, %2 : vector<2x16xf32>
    %4 = tpu.iota {dimensions = array<i32: 1>} : vector<2x16xi32>
    %c0_3 = arith.constant 0 : index
    %5 = memref.load %arg2[%c0_3] : memref<1xf32, #tpu.memory_space<smem>>
    %6 = vector.broadcast %5 : f32 to vector<2x16xf32>
    %c1_i32 = arith.constant 1 : i32
    %7 = tpu.dynamic_rotate %3 by %c1_i32 dim 1 : vector<2x16xf32>, i32 -> vector<2x16xf32>
    %c-1_i32 = arith.constant -1 : i32
    %8 = vector.broadcast %c-1_i32 : i32 to vector<2x16xi32>
    %9 = arith.addi %4, %8 : vector<2x16xi32>
    %c0_i32 = arith.constant 0 : i32
    %10 = vector.broadcast %c0_i32 : i32 to vector<2x16xi32>
    %11 = arith.cmpi sge, %9, %10 : vector<2x16xi32>
    %c-1_i32_4 = arith.constant -1 : i32
    %12 = vector.broadcast %c-1_i32_4 : i32 to vector<2x16xi32>
    %13 = arith.addi %4, %12 : vector<2x16xi32>
    %c16_i32 = arith.constant 16 : i32
    %14 = vector.broadcast %c16_i32 : i32 to vector<2x16xi32>
    %15 = arith.cmpi slt, %13, %14 : vector<2x16xi32>
    %16 = arith.andi %11, %15 : vector<2x16xi1>
    %c0_5 = arith.constant 0 : index
    %17 = memref.load %arg1[%c0_5] : memref<3xf32, #tpu.memory_space<smem>>
    %cst_6 = arith.constant 0.000000e+00 : f32
    %18 = vector.broadcast %cst_6 : f32 to vector<2x16xf32>
    %19 = arith.select %16, %7, %18 : vector<2x16xi1>, vector<2x16xf32>
    %20 = vector.broadcast %17 : f32 to vector<2x16xf32>
    %21 = arith.mulf %20, %19 : vector<2x16xf32>
    %22 = arith.addf %6, %21 : vector<2x16xf32>
    %c0_i32_7 = arith.constant 0 : i32
    %23 = vector.broadcast %c0_i32_7 : i32 to vector<2x16xi32>
    %24 = arith.addi %4, %23 : vector<2x16xi32>
    %c0_i32_8 = arith.constant 0 : i32
    %25 = vector.broadcast %c0_i32_8 : i32 to vector<2x16xi32>
    %26 = arith.cmpi sge, %24, %25 : vector<2x16xi32>
    %c0_i32_9 = arith.constant 0 : i32
    %27 = vector.broadcast %c0_i32_9 : i32 to vector<2x16xi32>
    %28 = arith.addi %4, %27 : vector<2x16xi32>
    %c16_i32_10 = arith.constant 16 : i32
    %29 = vector.broadcast %c16_i32_10 : i32 to vector<2x16xi32>
    %30 = arith.cmpi slt, %28, %29 : vector<2x16xi32>
    %31 = arith.andi %26, %30 : vector<2x16xi1>
    %c1 = arith.constant 1 : index
    %32 = memref.load %arg1[%c1] : memref<3xf32, #tpu.memory_space<smem>>
    %cst_11 = arith.constant 0.000000e+00 : f32
    %33 = vector.broadcast %cst_11 : f32 to vector<2x16xf32>
    %34 = arith.select %31, %3, %33 : vector<2x16xi1>, vector<2x16xf32>
    %35 = vector.broadcast %32 : f32 to vector<2x16xf32>
    %36 = arith.mulf %35, %34 : vector<2x16xf32>
    %37 = arith.addf %22, %36 : vector<2x16xf32>
    %c15_i32 = arith.constant 15 : i32
    %38 = tpu.dynamic_rotate %3 by %c15_i32 dim 1 : vector<2x16xf32>, i32 -> vector<2x16xf32>
    %c1_i32_12 = arith.constant 1 : i32
    %39 = vector.broadcast %c1_i32_12 : i32 to vector<2x16xi32>
    %40 = arith.addi %4, %39 : vector<2x16xi32>
    %c0_i32_13 = arith.constant 0 : i32
    %41 = vector.broadcast %c0_i32_13 : i32 to vector<2x16xi32>
    %42 = arith.cmpi sge, %40, %41 : vector<2x16xi32>
    %c1_i32_14 = arith.constant 1 : i32
    %43 = vector.broadcast %c1_i32_14 : i32 to vector<2x16xi32>
    %44 = arith.addi %4, %43 : vector<2x16xi32>
    %c16_i32_15 = arith.constant 16 : i32
    %45 = vector.broadcast %c16_i32_15 : i32 to vector<2x16xi32>
    %46 = arith.cmpi slt, %44, %45 : vector<2x16xi32>
    %47 = arith.andi %42, %46 : vector<2x16xi1>
    %c2 = arith.constant 2 : index
    %48 = memref.load %arg1[%c2] : memref<3xf32, #tpu.memory_space<smem>>
    %cst_16 = arith.constant 0.000000e+00 : f32
    %49 = vector.broadcast %cst_16 : f32 to vector<2x16xf32>
    %50 = arith.select %47, %38, %49 : vector<2x16xi1>, vector<2x16xf32>
    %51 = vector.broadcast %48 : f32 to vector<2x16xf32>
    %52 = arith.mulf %51, %50 : vector<2x16xf32>
    %53 = arith.addf %37, %52 : vector<2x16xf32>
    %54 = arith.negf %53 : vector<2x16xf32>
    %55 = math.exp %54 : vector<2x16xf32>
    %cst_17 = arith.constant 1.000000e+00 : f32
    %56 = vector.broadcast %cst_17 : f32 to vector<2x16xf32>
    %57 = arith.addf %56, %55 : vector<2x16xf32>
    %58 = arith.divf %56, %57 : vector<2x16xf32>
    %59 = vector.shape_cast %58 : vector<2x16xf32> to vector<2x16x1xf32>
    %60 = vector.broadcast %59 : vector<2x16x1xf32> to vector<2x16x256xf32>
    %61 = arith.mulf %0, %60 : vector<2x16x256xf32>
    %c0_18 = arith.constant 0 : index
    %c0_19 = arith.constant 0 : index
    %c0_20 = arith.constant 0 : index
    %62 = vector.load %arg4[%c0_18, %c0_19, %c0_20] : memref<2x16x256xf32, #tpu.memory_space<vmem>>, vector<2x16x256xf32>
    tpu.vector_store %arg4[%c0_18, %c0_19, %c0_20], %61 {strides = array<i32>} : memref<2x16x256xf32, #tpu.memory_space<vmem>>, vector<2x16x256xf32>,
    return
  }
  func.func @transform_0(%arg0: i32) -> i32 {
    %c0_i32 = arith.constant 0 : i32
    %c0_i32_0 = arith.constant 0 : i32
    return %c0_i32 : i32
  }
  func.func @transform_1(%arg0: i32) -> i32 {
    %c0_i32 = arith.constant 0 : i32
    %c0_i32_0 = arith.constant 0 : i32
    return %c0_i32 : i32
  }
  func.func @transform_2(%arg0: i32) -> (i32, i32, i32) {
    %c0_i32 = arith.constant 0 : i32
    %c0_i32_0 = arith.constant 0 : i32
    %c0_i32_1 = arith.constant 0 : i32
    return %arg0, %c0_i32, %c0_i32_0 : i32, i32, i32
  }
  func.func @transform_3(%arg0: i32) -> (i32, i32, i32) {
    %c0_i32 = arith.constant 0 : i32
    %c0_i32_0 = arith.constant 0 : i32
    %c0_i32_1 = arith.constant 0 : i32
    return %arg0, %c0_i32, %c0_i32_0 : i32, i32, i32
  }
}

</mosaic_0001>

<bundles_post_ra>
// kernel: _lambda_.1
= control target key start
LH: loop header
LB: loop body
LE: loop exit
PB: predicated region body
PF: predicated region fallthrough
CT: control target
= control target key end

     0   :  { %9 = vsyncpa [#allocation4], 0  ;;  %s206_s15 = smov [#allocation3]   ;;  %s316_s0 = inlined_call_operand.vmem [shape: f32[3], index: 0, kind: input, shape index: {}]   ;;  %s317_s1 = inlined_call_operand.<no memory space> [shape: f32[1], index: 1, kind: input, shape index: {}]   ;;  %s318_s2 = inlined_call_operand.vmem [shape: f32[2,16,256], index: 2, kind: input, shape index: {}]   ;;  %s319_s3 = inlined_call_operand.vmem [shape: f32[2,16,256], index: 3, kind: output, shape index: {}]  }
   0x1   :  { %s15_s14 = sshll.u32 %s316_s0, 4  ;;  %s16_s14 = int_to_ptr.vmem [resolvable:$true] %s15_s14 }
   0x2   :  { %18 = dma.vmem_to_smem %s16_s14, 16, %s206_s15, [#allocation4]  }
   0x3   :  { %204 = dma.done.wait [#allocation4], 16  }
   0x4   :  { %205 = vsyncadd [#allocation4], 4294967280 }
   0x5   :  { %27 = sfence }
   0x6   :  { %v236_v0 = vld [vmem:[%s318_s2 + $0x20] sm:$0xff]  ;;  %v241_v1 = vld [vmem:[%s318_s2 + $0x28] sm:$0xff]  ;;  %v260_v6 = vld [vmem:[%s318_s2 + $0x30] sm:$0xff]  ;;  %v52_v13 = vlaneseq  ;;  %vm63_vm0 = vcmask 130112   ;;  %vm68_vm1 = vcmask 1041409   ;;  %vm71_vm2 = vcmask 1047680  }
   0x7   :  { %v246_v2 = vld [vmem:[%s318_s2] sm:$0xff]  ;;  %v42_v3 = vadd.f32 %v241_v1, %v236_v0  ;;  %v253_v4 = vld [vmem:[%s318_s2 + $0x8] sm:$0xff]  ;;  %v265_v7 = vld [vmem:[%s318_s2 + $0x38] sm:$0xff]  ;;  %s208_s4 = smov 127   ;;  %s209_s5 = smov 113   ;;  %v55_v42 = vstv %s317_s1 }
   0x8   :  { %v36_v5 = vadd.f32 %v253_v4, %v246_v2  ;;  %v270_v8 = vld [vmem:[%s318_s2 + $0x10] sm:$0xff]  ;;  %v275_v9 = vld [vmem:[%s318_s2 + $0x18] sm:$0xff]  ;;  %v45_v10 = vadd.f32 %v265_v7, %v260_v6  ;;  %v53_v15 = vand.u32 127, %v52_v13  ;;  %s207_s2 = smov 16   ;;  %v132_v34 = vshrl.u32 %v52_v13, 7  ;;  %s82_s6 = sld [smem:[#allocation3]] }
   0x9   :  { %43 = vadd.xlane.f32.xlu1 %v42_v3  ;;  %v39_v11 = vadd.f32 %v275_v9, %v270_v8  ;;  %s177_s7 = sld [smem:[#allocation3 + $0x1]] }
   0xa   :  { %37 = vadd.xlane.f32.xlu0 %v36_v5  ;;  %v61_v17 = vadd.s32 4294967288, %v53_v15  ;;  %v78_v35 = vadd.s32 4294967295, %v53_v15  ;;  %184 = vset.pattern.permute.xlu2 %v132_v34  ;;  %v139_v36 = vadd.s32 8, %v132_v34  ;;  %s178_s8 = sld [smem:[#allocation3 + $0x2]]  ;;  %v99_v37 = vadd.s32 1, %v53_v15 }
   0xb   :  { %vm92_vm5 = vcmp.lt.s32.totalorder %v53_v15, 16 }
   0xc   :  { %187 = vset.pattern.permute.xlu0 %v139_v36  ;;  %vm79_vm3 = vcmp.ge.s32.totalorder %v78_v35, 0  ;;  %vm80_vm4 = vcmp.lt.s32.totalorder %v78_v35, 16  ;;  %vm101_vm7 = vcmp.lt.s32.totalorder %v99_v37, 16 }
   0xd   :  { %vm81_vm6 = vmand %vm79_vm3, %vm80_vm4 }
   0xe   :  { %v88_v38 = vstv %s82_s6 }
   0xf   :  { %v96_v43 = vstv %s177_s7 }
  0x10   :  { %v108_v46 = vstv %s178_s8 }
  0x11   :  { %46 = vadd.xlane.f32.xlu1 %v45_v10 }
  0x12   :  { %40 = vadd.xlane.f32.xlu0 %v39_v11 }
  0x7c   :  { %v44_v12 = vpop.xlane.xlu1 %43 }
  0x7d   :  { %v38_v14 = vpop.xlane.xlu0 %37  ;;  %v50_v16 = vmul.f32 0.00390625, %v44_v12 }
  0x7e   :  { %v48_v18 = vmul.f32 0.00390625, %v38_v14 }
  0x7f   :  { %v65_v23 = vperm.slane %v50_v16, %v53_v15 }
  0x80   :  { %v60_v25 = vperm.slane %v48_v18, %v53_v15 }
  0x84   :  { %v47_v19 = vpop.xlane.xlu1 %46 }
  0x85   :  { %v51_v20 = vmul.f32 0.00390625, %v47_v19  ;;  %v41_v21 = vpop.xlane.xlu0 %40 }
  0x86   :  { %v49_v22 = vmul.f32 0.00390625, %v41_v21 }
  0x87   :  { %v66_v24 = vperm.slane %v51_v20, %v61_v17 }
  0x88   :  { %v62_v26 = vperm.slane %v49_v22, %v61_v17 }
  0x89   :  { %v67_v27 = vsel %vm63_vm0, %v66_v24, %v65_v23 }
  0x8a   :  { %v64_v28 = vsel %vm63_vm0, %v62_v26, %v60_v25 }
  0x8b   :  { %v69_v29 = vsel %vm68_vm1, %v67_v27, %v64_v28 }
  0x8c   :  { %72 = vrot.lane.b32.xlu2 %v69_v29, %s207_s2  ;;  %v95_v41 = vsel %vm92_vm5, %v69_v29, 0.0 }
  0x8d   :  { %v97_v49 = vmul.f32 %v96_v43, %v95_v41 }
  0xe6   :  { %v73_v30 = vpop.permute.xlu2 %72 }
  0xe7   :  { %v74_v31 = vsel %vm71_vm2, %v73_v30, %v69_v29 }
  0xe8   :  { %75 = vrot.lane.b32.xlu2 %v74_v31, %s207_s2 }
 0x142   :  { %v76_v32 = vpop.permute.xlu2 %75 }
 0x143   :  { %v77_v33 = vsel %vm71_vm2, %v76_v32, %v69_v29 }
 0x144   :  { %104 = vrot.lane.b32.xlu1 %v77_v33, %s208_s4  ;;  %84 = vrot.lane.b32.xlu0 %v77_v33, %s209_s5 }
 0x1b6   :  { %v105_v39 = vpop.permute.xlu1 %104  ;;  %v85_v40 = vpop.permute.xlu0 %84 }
 0x1b7   :  { %v87_v44 = vsel %vm81_vm6, %v85_v40, 0.0  ;;  %v107_v47 = vsel %vm101_vm7, %v105_v39, 0.0 }
 0x1b8   :  { %v89_v45 = vmul.f32 %v88_v38, %v87_v44  ;;  %v109_v50 = vmul.f32 %v108_v46, %v107_v47 }
 0x1ba   :  { %v90_v48 = vadd.f32 %v89_v45, %v55_v42 }
 0x1bc   :  { %v98_v51 = vadd.f32 %v97_v49, %v90_v48 }
 0x1be   :  { %v110_v52 = vadd.f32 %v109_v50, %v98_v51 }
 0x1c0   :  { %v179_v53 = vmul.f32 -1.442695, %v110_v52 }
 0x1c2   :  { %188 = vpow2.f32 %v179_v53 }
 0x1c8   :  { %v189_v54 = vpop.eup %188 }
 0x1c9   :  { %v114_v55 = vadd.f32 1.0, %v189_v54 }
 0x1cb   :  { %190 = vrcp.f32 %v114_v55  ;;  %v126_v59 = vand.u32 2147483648, %v114_v55  ;;  %v124_v61 = vand.u32 2147483647, %v114_v55  ;;  %vm120_vm9 = vweird.f32 %v114_v55 }
 0x1cd   :  { %v127_v63 = vor.u32 1.1754944e-38, %v126_v59  ;;  %vm125_vm11 = vcmp.eq.f32.partialorder %v124_v61, 8.507059e+37 }
 0x1d1   :  { %v191_v56 = vpop.eup %190 }
 0x1d2   :  { %v116_v57 = vmul.f32 %v191_v56, %v114_v55  ;;  %vm121_vm8 = vweird.f32 %v191_v56 }
 0x1d3   :  { %vm122_vm10 = vmor %vm120_vm9, %vm121_vm8 }
 0x1d4   :  { %v117_v58 = vsub.f32 1.0, %v116_v57 }
 0x1d6   :  { %v118_v60 = vmul.f32 %v191_v56, %v117_v58 }
 0x1d8   :  { %v119_v62 = vadd.f32 %v191_v56, %v118_v60 }
 0x1da   :  { %v123_v3 = vsel %vm122_vm10, %v191_v56, %v119_v62 }
 0x1db   :  { %v128_v5 = vsel %vm125_vm11, %v127_v63, %v123_v3 }
 0x1dc   :  { %v143_v10 = vperm.slane %v128_v5, 1  ;;  %v130_v11 = vperm.slane %v128_v5, 0 }
 0x1de   :  { %154 = vperm.xlu0 %187, %v143_v10   ;;  %135 = vperm.xlu2 %184, %v130_v11  }
 0x1e6   :  { %185 = vset.pattern.permute.xlu2 %v139_v36 }
 0x1ee   :  { %141 = vperm.xlu2 %185, %v130_v11  }
 0x1f6   :  { %186 = vset.pattern.permute.xlu2 %v132_v34 }
 0x1fe   :  { %148 = vperm.xlu2 %186, %v143_v10  }
 0x238   :  { %v136_v12 = vpop.permute.xlu2 %135 }
 0x239   :  { %v156_v13 = vmul.f32 %v136_v12, %v246_v2  ;;  %v157_v14 = vmul.f32 %v136_v12, %v253_v4 }
 0x23b   :  { %164 = vst [vmem:[%s319_s3] sm:$0xff] %v156_v13 }
 0x23c   :  { %165 = vst [vmem:[%s319_s3 + $0x8] sm:$0xff] %v157_v14 }
 0x248   :  { %v142_v15 = vpop.permute.xlu2 %141 }
 0x249   :  { %v158_v16 = vmul.f32 %v142_v15, %v270_v8  ;;  %v159_v17 = vmul.f32 %v142_v15, %v275_v9 }
 0x24b   :  { %166 = vst [vmem:[%s319_s3 + $0x10] sm:$0xff] %v158_v16 }
 0x24c   :  { %167 = vst [vmem:[%s319_s3 + $0x18] sm:$0xff] %v159_v17 }
 0x250   :  { %v155_v2 = vpop.permute.xlu0 %154 }
 0x251   :  { %v162_v4 = vmul.f32 %v155_v2, %v260_v6  ;;  %v163_v18 = vmul.f32 %v155_v2, %v265_v7 }
 0x253   :  { %170 = vst [vmem:[%s319_s3 + $0x30] sm:$0xff] %v162_v4 }
 0x254   :  { %171 = vst [vmem:[%s319_s3 + $0x38] sm:$0xff] %v163_v18 }
 0x258   :  { %v149_v8 = vpop.permute.xlu2 %148 }
 0x259   :  { %v160_v9 = vmul.f32 %v149_v8, %v236_v0  ;;  %v161_v19 = vmul.f32 %v149_v8, %v241_v1 }
 0x25b   :  { %168 = vst [vmem:[%s319_s3 + $0x20] sm:$0xff] %v160_v9 }
 0x25c   :  { %169 = vst [vmem:[%s319_s3 + $0x28] sm:$0xff] %v161_v19 }
 0x25d   :  { %176 = vsyncpa [#allocation4], 1 }

</bundles_post_ra>
